<compile_context>
chip_gen: v5e
topology: v5e:2x2
jax: 0.10.0
libtpu: 0.0.40
codegen_flags: <defaults>
</compile_context>

<pallas_src>
import jax
import jax.numpy as jnp
from jax.experimental import pallas as pl
from jax.experimental.pallas import tpu as pltpu


def _round_up(x: int, m: int) -> int:
    return ((x + m - 1) // m) * m


def _vmem_budget_bytes() -> int:
    """Generation-aware VMEM budget with headroom for Mosaic scratch."""
    try:
        cap = pltpu.get_tpu_info().vmem_capacity_bytes
    except Exception:
        cap = 64 * 1024 * 1024  # conservative default: v7x per-TC VMEM
    return max(int(cap * 3 // 4), 16 * 1024 * 1024)


# ---------------------------------------------------------------------------
# Kernels
# ---------------------------------------------------------------------------
def _linear_fullk_kernel(x_ref, w_ref, b_ref, o_ref):
    # x_ref: (TM, F)   w_ref: (F, C_pad) VMEM-resident (constant block index)
    # b_ref: (1, C_pad)   o_ref: (TM, C_pad)
    # Single fused MXU dot (f32 accumulate) + bias add; no scratch needed.
    o_ref[...] = (
        jnp.dot(x_ref[...], w_ref[...], preferred_element_type=jnp.float32)
        + b_ref[...]
    ).astype(o_ref.dtype)


def _linear_ktiled_kernel(x_ref, w_ref, b_ref, o_ref, acc_ref):
    # x_ref: (TM, TK)  w_ref: (TK, C_pad)  b_ref: (1, C_pad)
    # acc_ref: (TM, C_pad) f32 scratch; reduction axis (k) is last/"arbitrary".
    k = pl.program_id(1)

    @pl.when(k == 0)
    def _():
        # Seed the accumulator with the broadcast bias: saves a full zero pass
        # plus the epilogue add over every output tile.
        acc_ref[...] = jnp.broadcast_to(
            b_ref[...].astype(jnp.float32), acc_ref.shape
        )

    acc_ref[...] += jnp.dot(
        x_ref[...], w_ref[...], preferred_element_type=jnp.float32
    )

    @pl.when(k == pl.num_programs(1) - 1)
    def _():
        o_ref[...] = acc_ref[...].astype(o_ref.dtype)


# ---------------------------------------------------------------------------
# Wrapper
# ---------------------------------------------------------------------------
def logistic_regression_forward(x, weight, bias):
    """Forward pass of LogisticRegressionMultiClass (== nn.Linear).

    x:      (batch, in_features) float32
    weight: (num_classes, in_features) float32  (PyTorch nn.Linear layout)
    bias:   (num_classes,) float32
    returns (batch, num_classes) float32 logits
    """
    batch, in_features = x.shape
    num_classes = weight.shape[0]
    dt = x.dtype
    itemsize = jnp.dtype(dt).itemsize

    budget = _vmem_budget_bytes()

    # ---- lane-dense output: pad classes to >=128; once C exceeds one lane
    #      group, pad to 256-wide multiples (v6e/v7x MXU width) --------------
    c_pad = _round_up(max(num_classes, 128), 128)
    if c_pad > 128:
        c_pad = _round_up(c_pad, 256)

    # ---- one-time wrapper transpose to (F, C_pad): canonical contraction ---
    # (tiny parameter; zero-padded classes are sliced away at the end)
    w_t = jnp.pad(weight, ((0, c_pad - num_classes), (0, 0))).T   # (F, c_pad)
    b2d = jnp.pad(bias, (0, c_pad - num_classes)).reshape(1, c_pad)

    # ---- can the whole (F, c_pad) weight live in VMEM? ---------------------
    w_bytes = 2 * in_features * c_pad * itemsize      # conservative: 2 buffers
    b_bytes = 2 * 8 * c_pad * itemsize

    def _fullk_fits(tm):
        x_bytes = 2 * tm * in_features * itemsize     # double-buffered x tiles
        o_bytes = 2 * tm * c_pad * itemsize           # double-buffered out
        return w_bytes + b_bytes + x_bytes + o_bytes <= budget

    batch8 = _round_up(batch, 8)
    tm_cands = [min(batch8, 1024)] + [t for t in (512, 256, 128) if t < batch8]
    tm_full = None
    for cand in tm_cands:
        if _fullk_fits(cand):
            tm_full = cand
            break

    if tm_full is not None:
        # ========================= full-K path ==============================
        tm = tm_full
        # Split a single large batch tile in two so the "parallel" batch axis
        # spans both TensorCores on v7x.
        if batch8 >= 256 and pl.cdiv(batch, tm) == 1:
            tm = _round_up(pl.cdiv(batch8, 2), 8)
        batch_pad = _round_up(batch, tm)

        x_p = x
        if batch_pad != batch:
            x_p = jnp.pad(x, ((0, batch_pad - batch), (0, 0)))

        grid = (batch_pad // tm,)

        cost = pl.CostEstimate(
            flops=2 * batch_pad * in_features * c_pad,
            bytes_accessed=itemsize * (batch_pad * in_features
                                       + in_features * c_pad
                                       + batch_pad * c_pad),
            transcendentals=0,
        )

        out_padded = pl.pallas_call(
            _linear_fullk_kernel,
            out_shape=jax.ShapeDtypeStruct((batch_pad, c_pad), dt),
            grid_spec=pltpu.PrefetchScalarGridSpec(
                num_scalar_prefetch=0,
                grid=grid,
                in_specs=[
                    pl.BlockSpec((tm, in_features), lambda i: (i, 0)),     # x tile
                    pl.BlockSpec((in_features, c_pad), lambda i: (0, 0)),  # W^T resident
                    pl.BlockSpec((1, c_pad), lambda i: (0, 0)),            # bias
                ],
                out_specs=pl.BlockSpec((tm, c_pad), lambda i: (i, 0)),
            ),
            compiler_params=pltpu.CompilerParams(
                dimension_semantics=("parallel",),
                vmem_limit_bytes=budget,
            ),
            cost_estimate=cost,
        )(x_p, w_t, b2d)
    else:
        # =================== K-tiled fallback (huge F only) =================
        # TODO(synk): if this path ever becomes hot, switch the weight to a
        # resident full block + in-kernel pl.ds() K slicing to avoid the
        # per-batch-tile weight re-stream.
        tk = 2048
        f_pad = _round_up(in_features, tk)

        tm = 128
        for cand in (512, 256, 128):
            need = (2 * cand * tk * itemsize          # x tiles
                    + 2 * tk * c_pad * itemsize       # streamed weight tiles
                    + b_bytes
                    + 2 * cand * c_pad * itemsize     # out tiles
                    + cand * c_pad * 4)               # f32 accumulator
            if need <= budget:
                tm = cand
                break
        tm = min(tm, batch8)
        batch_pad = _round_up(batch, tm)

        x_p = x
        if batch_pad != batch or f_pad != in_features:
            x_p = jnp.pad(x, ((0, batch_pad - batch), (0, f_pad - in_features)))
        w_p = jnp.pad(w_t, ((0, f_pad - in_features), (0, 0)))

        grid = (batch_pad // tm, f_pad // tk)

        cost = pl.CostEstimate(
            flops=2 * batch_pad * f_pad * c_pad,
            bytes_accessed=itemsize * (batch_pad * f_pad
                                       + grid[0] * f_pad * c_pad
                                       + batch_pad * c_pad),
            transcendentals=0,
        )

        out_padded = pl.pallas_call(
            _linear_ktiled_kernel,
            out_shape=jax.ShapeDtypeStruct((batch_pad, c_pad), dt),
            grid_spec=pltpu.PrefetchScalarGridSpec(
                num_scalar_prefetch=0,
                grid=grid,
                in_specs=[
                    pl.BlockSpec((tm, tk), lambda i, k: (i, k)),        # x tile
                    pl.BlockSpec((tk, c_pad), lambda i, k: (k, 0)),     # W^T K tile
                    pl.BlockSpec((1, c_pad), lambda i, k: (0, 0)),      # bias
                ],
                out_specs=pl.BlockSpec((tm, c_pad), lambda i, k: (i, 0)),
                scratch_shapes=[pltpu.VMEM((tm, c_pad), jnp.float32)],
            ),
            compiler_params=pltpu.CompilerParams(
                dimension_semantics=("parallel", "arbitrary"),
                vmem_limit_bytes=budget,
            ),
            cost_estimate=cost,
        )(x_p, w_p, b2d)

    # slice away batch / class padding
    return out_padded[:batch, :num_classes]


if __name__ == "__main__":
    key = jax.random.PRNGKey(0)

    def _make_case(key, batch, in_features, num_classes):
        kx, kw, kb = jax.random.split(key, 3)
        bound = 1.0 / (in_features ** 0.5)
        weight = jax.random.uniform(kw, (num_classes, in_features),
                                    minval=-bound, maxval=bound,
                                    dtype=jnp.float32)
        bias = jax.random.uniform(kb, (num_classes,),
                                  minval=-bound, maxval=bound,
                                  dtype=jnp.float32)
        x = jax.random.normal(kx, (batch, in_features), dtype=jnp.float32)
        return x, weight, bias

    k1, k2 = jax.random.split(key)

    # Case 1: small shapes matching the module's typical use.
    x, weight, bias = _make_case(k1, batch=16, in_features=32, num_classes=8)
    logits = jax.block_until_ready(logistic_regression_forward(x, weight, bias))
    ref = x @ weight.T + bias
    assert logits.shape == (16, 8)
    assert jnp.allclose(logits, ref, atol=1e-5, rtol=1e-5)

    # Case 2: ragged batch / non-aligned feature count (exercises tiling,
    # the 2-tile batch split, and the batch-only padding path).
    x2, w2, b2 = _make_case(k2, batch=300, in_features=160, num_classes=10)
    logits2 = jax.block_until_ready(logistic_regression_forward(x2, w2, b2))
    ref2 = x2 @ w2.T + b2
    assert logits2.shape == (300, 10)
    assert jnp.allclose(logits2, ref2, atol=1e-4, rtol=1e-4)

    print("KERNEL_OK")
</pallas_src>

<mosaic_0001>
module attributes {stable_mosaic.version = 11 : i64} {
  func.func @_linear_fullk_kernel(%arg0: i32, %arg1: memref<16x32xf32, #tpu.memory_space<vmem>>, %arg2: memref<32x128xf32, #tpu.memory_space<vmem>>, %arg3: memref<1x128xf32, #tpu.memory_space<vmem>>, %arg4: memref<16x128xf32, #tpu.memory_space<vmem>>) attributes {dimension_semantics = [#tpu.dimension_semantics<parallel>], iteration_bounds = array<i64: 1>, scalar_prefetch = 0 : i64, scratch_operands = 0 : i64, tpu.core_type = #tpu.core_type<tc>, window_params = [{transform_indices = @transform_0, window_bounds = array<i64: 16, 32>}, {pipeline_mode = #tpu.pipeline_mode<synchronous>, transform_indices = @transform_1, window_bounds = array<i64: 32, 128>}, {pipeline_mode = #tpu.pipeline_mode<synchronous>, transform_indices = @transform_2, window_bounds = array<i64: 1, 128>}, {transform_indices = @transform_3, window_bounds = array<i64: 16, 128>}]} {
    %c0 = arith.constant 0 : index
    %c0_0 = arith.constant 0 : index
    %0 = vector.load %arg1[%c0, %c0_0] : memref<16x32xf32, #tpu.memory_space<vmem>>, vector<16x32xf32>
    %c0_1 = arith.constant 0 : index
    %c0_2 = arith.constant 0 : index
    %1 = vector.load %arg2[%c0_1, %c0_2] : memref<32x128xf32, #tpu.memory_space<vmem>>, vector<32x128xf32>
    %cst = arith.constant dense<0.000000e+00> : vector<16x128xf32>
    %2 = tpu.matmul %0, %1, %cst {dimension_numbers = #tpu.dot_dimension_numbers<[1], [0], [0], [1], [0, 0, 1, 1], [], []>} : vector<16x32xf32>, vector<32x128xf32>, vector<16x128xf32> -> vector<16x128xf32>
    %c0_3 = arith.constant 0 : index
    %c0_4 = arith.constant 0 : index
    %3 = vector.load %arg3[%c0_3, %c0_4] : memref<1x128xf32, #tpu.memory_space<vmem>>, vector<1x128xf32>
    %4 = vector.broadcast %3 : vector<1x128xf32> to vector<16x128xf32>
    %5 = arith.addf %2, %4 : vector<16x128xf32>
    %c0_5 = arith.constant 0 : index
    %c0_6 = arith.constant 0 : index
    %6 = vector.load %arg4[%c0_5, %c0_6] : memref<16x128xf32, #tpu.memory_space<vmem>>, vector<16x128xf32>
    tpu.vector_store %arg4[%c0_5, %c0_6], %5 {strides = array<i32>} : memref<16x128xf32, #tpu.memory_space<vmem>>, vector<16x128xf32>,
    return
  }
  func.func @transform_0(%arg0: i32) -> (i32, i32) {
    %c0_i32 = arith.constant 0 : i32
    %c0_i32_0 = arith.constant 0 : i32
    return %arg0, %c0_i32 : i32, i32
  }
  func.func @transform_1(%arg0: i32) -> (i32, i32) {
    %c0_i32 = arith.constant 0 : i32
    %c0_i32_0 = arith.constant 0 : i32
    %c0_i32_1 = arith.constant 0 : i32
    return %c0_i32, %c0_i32_0 : i32, i32
  }
  func.func @transform_2(%arg0: i32) -> (i32, i32) {
    %c0_i32 = arith.constant 0 : i32
    %c0_i32_0 = arith.constant 0 : i32
    %c0_i32_1 = arith.constant 0 : i32
    return %c0_i32, %c0_i32_0 : i32, i32
  }
  func.func @transform_3(%arg0: i32) -> (i32, i32) {
    %c0_i32 = arith.constant 0 : i32
    %c0_i32_0 = arith.constant 0 : i32
    return %arg0, %c0_i32 : i32, i32
  }
}

</mosaic_0001>

<bundles_post_ra>
// kernel: tpu_custom_call.1
= control target key start
LH: loop header
LB: loop body
LE: loop exit
PB: predicated region body
PF: predicated region fallthrough
CT: control target
= control target key end

     0   :  { %8 = vsyncpa [#allocation3], 0  ;;  %s245_s0 = inlined_call_operand.hbm [shape: f32[16,32], index: 0, kind: input, shape index: {}]   ;;  %s246_s1 = inlined_call_operand.hbm [shape: f32[32,128], index: 1, kind: input, shape index: {}]   ;;  %s247_s2 = inlined_call_operand.vmem [shape: f32[1,128], index: 2, kind: input, shape index: {}]   ;;  %s248_s3 = inlined_call_operand.hbm [shape: f32[16,128], index: 3, kind: output, shape index: {}]  }
   0x1   :  { %9 = vsyncpa [#allocation6], 0 }
   0x2   :  { %10 = vsyncpa [#allocation4], 0  ;;  %s15_s14 = sshll.u32 %s245_s0, 4  ;;  %s199_s15 = smov [#allocation2]   ;;  %s16_s14 = int_to_ptr.hbm [resolvable:$true] %s15_s14 }
   0x3   :  { %s17_s16 = sshll.u32 %s199_s15, 4  ;;  %s28_s19 = sshll.u32 %s246_s1, 4  ;;  %s18_s16 = int_to_ptr.vmem [resolvable:$true] %s17_s16  ;;  %s29_s19 = int_to_ptr.hbm [resolvable:$true] %s28_s19 }
   0x4   :  { %s200_s20 = smov 128   ;;  %s201_s21 = smov 8  }
   0x5   :  { %23 = dma.hbm_to_vmem [thread:$0]  %s16_s14, 256, %s18_s16, [#allocation3], %s200_s20, %s200_s20, %s201_s21  }
   0x6   :  { %s202_s22 = smov [#allocation5]  }
   0x7   :  { %s30_s23 = sshll.u32 %s202_s22, 4  ;;  %s31_s23 = int_to_ptr.vmem [resolvable:$true] %s30_s23 }
   0x8   :  { %36 = dma.hbm_to_vmem [thread:$0]  %s29_s19, 512, %s31_s23, [#allocation6], %s200_s20, %s200_s20, %s201_s21  }
   0x9   :  { %193 = dma.done.wait [#allocation3], 256  }
   0xa   :  { %194 = vsyncadd [#allocation3], 4294967040 }
   0xb   :  { %195 = dma.done.wait [#allocation6], 512  }
   0xc   :  { %196 = vsyncadd [#allocation6], 4294966784  ;;  %v52_v0 = vld [vmem:[#allocation5 + $0x18] sm:$0xff]  ;;  %v51_v1 = vld [vmem:[#allocation5 + $0x10] sm:$0xff]  ;;  %vm57_vm0 = vcmask 261120   ;;  %s203_s24 = smov [#allocation7]  }
   0xd   :  { %76 = vmatpush.msra.mxu0 %v52_v0  ;;  %111 = vmatpush.msra.mxu1 %v52_v0  ;;  %v50_v2 = vld [vmem:[#allocation5 + $0x8] sm:$0xff]  ;;  %v49_v3 = vld [vmem:[#allocation5] sm:$0xff]  ;;  %v47_v4 = vld [vmem:[#allocation2] sm:$0xff]  ;;  %s93_s25 = sshll.u32 %s203_s24, 4  ;;  %s95_s28 = sshll.u32 %s248_s3, 4  ;;  %s94_s25 = int_to_ptr.vmem [resolvable:$true] %s93_s25  ;;  %s96_s28 = int_to_ptr.hbm [resolvable:$true] %s95_s28 }
   0xe   :  { %v48_v5 = vld [vmem:[#allocation2 + $0x8] sm:$0xff]  ;;  %v120_v6 = vld [vmem:[%s247_s2] ss:$0 sm:$0xff] }
   0xf   :  { %77 = vmatpush.msra.mxu0 %v51_v1  ;;  %112 = vmatpush.msra.mxu1 %v51_v1 }
  0x11   :  { %78 = vmatpush.msra.mxu0 %v50_v2  ;;  %113 = vmatpush.msra.mxu1 %v50_v2 }
  0x13   :  { %79 = vmatpush.msra.mxu0 %v49_v3  ;;  %114 = vmatpush.msra.mxu1 %v49_v3 }
  0x14   :  { %109 = vmatmul.msk.f32.vlgmr.msra.gmra.mxu0 %vm57_vm0, %v47_v4  ;;  %110 = vmatmul.msk.f32.vlgmr.msra.gmra.mxu1 %vm57_vm0, %v48_v5 }
  0x91   :  { %v81_v7 = vpop.f32.mrf.mxu0  ;;  %v84_v8 = vpop.f32.mrf.mxu1 }
  0x92   :  { %v82_v9 = vadd.f32 %v120_v6, %v81_v7  ;;  %v85_v10 = vadd.f32 %v120_v6, %v84_v8 }
  0x94   :  { %87 = vst [vmem:[#allocation7] sm:$0xff] %v82_v9 }
  0x95   :  { %88 = vst [vmem:[#allocation7 + $0x8] sm:$0xff] %v85_v10 }
  0x96   :  { %101 = dma.vmem_to_hbm [thread:$0]  %s94_s25, 256, %s96_s28, [#allocation4], %s200_s20, %s200_s20, %s201_s21  }
  0x97   :  { %197 = dma.done.wait [#allocation4], 256  }
  0x98   :  { %198 = vsyncadd [#allocation4], 4294967040 }
  0x99   :  { %106 = vsyncpa [#allocation3], 1 }
  0x9a   :  { %107 = vsyncpa [#allocation6], 1 }
  0x9b   :  { %108 = vsyncpa [#allocation4], 1 }

</bundles_post_ra>
